<compile_context>
chip_gen: v6e
topology: v6e:2x2x1
jax: 0.10.0
libtpu: 0.0.40
codegen_flags: <defaults>
</compile_context>

<pallas_src>
import jax
import jax.numpy as jnp
from jax.experimental import pallas as pl
from jax.experimental.pallas import tpu as pltpu


# ---------------------------------------------------------------------------
# Pallas kernel
# ---------------------------------------------------------------------------
def _relu_kernel(x_ref, o_ref):
    # Elementwise ReLU on one lane-dense VMEM tile (VPU).
    o_ref[...] = jnp.maximum(x_ref[...], 0).astype(o_ref.dtype)


# ---------------------------------------------------------------------------
# Wrapper
# ---------------------------------------------------------------------------
def relu_pallas(x, *, target_block_elems=2 * 1024 * 1024,
                vmem_limit_bytes=48 * 1024 * 1024):
    """Elementwise ReLU via a lane-dense, tiled, auto-pipelined Pallas kernel."""
    orig_shape = x.shape
    dtype = x.dtype
    total = int(x.size)
    if total == 0:
        return x

    itemsize = jnp.dtype(dtype).itemsize
    # Sublane requirement: f32 -> 8, bf16 -> 16, int8/fp8 -> 32.
    min_sub = max(8, 32 // itemsize)

    # Pick the widest lane-dense width (multiple of 128) that divides `total`
    # exactly, so the 2-D view is a zero-copy reshape (no pad, no slice).
    lane = None
    for cand in (8192, 4096, 2048, 1024):
        if total % cand == 0:
            lane = cand
            break

    flat = x.reshape(-1)
    if lane is None:
        # Rare unaligned case: pad to a multiple of 1024 only (never a full
        # block).  Zero padding is semantically safe for ReLU.
        lane = 1024
        padded = pl.cdiv(total, lane) * lane
        flat = jnp.pad(flat, (0, padded - total))
        needs_slice = True
    else:
        padded = total
        needs_slice = False

    rows = padded // lane
    x2d = flat.reshape(rows, lane)

    # Choose block rows: aim for ~target_block_elems per block (8 MiB f32),
    # always a multiple of the dtype's sublane requirement (or the full dim).
    if rows <= min_sub:
        br = rows  # single block equal to full array dims -> always legal
    else:
        br = max(min_sub, (target_block_elems // lane) // min_sub * min_sub)
        if br >= rows:
            if rows >= 2 * min_sub:
                # Split into >= 2 blocks so ("parallel",) can shard across
                # the 2 TensorCores on v7x; harmless on v5e/v6e.
                br = pl.cdiv(pl.cdiv(rows, 2), min_sub) * min_sub
            else:
                br = rows
    grid = (pl.cdiv(rows, br),)

    out2d = pl.pallas_call(
        _relu_kernel,
        out_shape=jax.ShapeDtypeStruct((rows, lane), dtype),
        grid=grid,
        in_specs=[pl.BlockSpec((br, lane), lambda i: (i, 0))],
        out_specs=pl.BlockSpec((br, lane), lambda i: (i, 0)),
        compiler_params=pltpu.CompilerParams(
            dimension_semantics=("parallel",),
            vmem_limit_bytes=vmem_limit_bytes,
        ),
        cost_estimate=pl.CostEstimate(
            flops=total,
            transcendentals=0,
            bytes_accessed=2 * total * itemsize,
        ),
    )(x2d)

    if needs_slice:
        return out2d.reshape(-1)[:total].reshape(orig_shape)
    return out2d.reshape(orig_shape)


class ReluHessianPallas:
    """JAX/Pallas equivalent of Relu_hessian (forward pass only)."""

    def __init__(self):
        self.activation = "relu"
        self.x = None

    def __call__(self, x):
        self.x = x  # stored, as in the PyTorch module, for a later compute_hessian()
        return relu_pallas(x)


# ---------------------------------------------------------------------------
# Main
# ---------------------------------------------------------------------------
if __name__ == "__main__":
    key = jax.random.PRNGKey(0)
    k1, k2 = jax.random.split(key)

    mod = ReluHessianPallas()

    # Small NCHW shape consistent with the module's usage (aligned fast path,
    # single full-array block).
    x_small = jax.random.normal(k1, (2, 4, 16, 16), jnp.float32)
    y_small = jax.block_until_ready(mod(x_small))
    assert y_small.shape == x_small.shape, y_small.shape
    assert jnp.array_equal(y_small, jnp.maximum(x_small, 0.0)), "small mismatch"

    # Larger shape exercising the multi-block, pipelined / megacore-split path.
    x_big = jax.random.normal(k2, (4, 32, 128, 128), jnp.float32)
    y_big = jax.block_until_ready(mod(x_big))
    assert y_big.shape == x_big.shape, y_big.shape
    assert jnp.array_equal(y_big, jnp.maximum(x_big, 0.0)), "big mismatch"

    # Unaligned shape exercising the (rare) padding fallback.
    x_odd = jax.random.normal(k1, (3, 5, 7, 11), jnp.float32)
    y_odd = jax.block_until_ready(relu_pallas(x_odd))
    assert y_odd.shape == x_odd.shape, y_odd.shape
    assert jnp.array_equal(y_odd, jnp.maximum(x_odd, 0.0)), "odd mismatch"

    print("KERNEL_OK")
</pallas_src>

<mosaic_0001>
module attributes {stable_mosaic.version = 11 : i64} {
  func.func @_relu_kernel(%arg0: i32, %arg1: memref<1x2048xf32, #tpu.memory_space<vmem>>, %arg2: memref<1x2048xf32, #tpu.memory_space<vmem>>) attributes {dimension_semantics = [#tpu.dimension_semantics<parallel>], iteration_bounds = array<i64: 1>, scalar_prefetch = 0 : i64, scratch_operands = 0 : i64, tpu.core_type = #tpu.core_type<tc>, window_params = [{transform_indices = @transform_0, window_bounds = array<i64: 1, 2048>}, {transform_indices = @transform_1, window_bounds = array<i64: 1, 2048>}]} {
    %c0 = arith.constant 0 : index
    %c0_0 = arith.constant 0 : index
    %0 = vector.load %arg1[%c0, %c0_0] : memref<1x2048xf32, #tpu.memory_space<vmem>>, vector<1x2048xf32>
    %cst = arith.constant 0.000000e+00 : f32
    %1 = vector.broadcast %cst : f32 to vector<1x2048xf32>
    %2 = arith.maximumf %0, %1 : vector<1x2048xf32>
    %c0_1 = arith.constant 0 : index
    %c0_2 = arith.constant 0 : index
    %3 = vector.load %arg2[%c0_1, %c0_2] : memref<1x2048xf32, #tpu.memory_space<vmem>>, vector<1x2048xf32>
    tpu.vector_store %arg2[%c0_1, %c0_2], %2 {strides = array<i32>} : memref<1x2048xf32, #tpu.memory_space<vmem>>, vector<1x2048xf32>,
    return
  }
  func.func @transform_0(%arg0: i32) -> (i32, i32) {
    %c0_i32 = arith.constant 0 : i32
    %c0_i32_0 = arith.constant 0 : i32
    return %arg0, %c0_i32 : i32, i32
  }
  func.func @transform_1(%arg0: i32) -> (i32, i32) {
    %c0_i32 = arith.constant 0 : i32
    %c0_i32_0 = arith.constant 0 : i32
    return %arg0, %c0_i32 : i32, i32
  }
}

</mosaic_0001>

<bundles_post_ra>
// kernel: tpu_custom_call.1
= control target key start
LH: loop header
LB: loop body
LE: loop exit
PB: predicated region body
PF: predicated region fallthrough
CT: control target
= control target key end

     0   :  { %6 = vsyncpa [#allocation3], 0  ;;  %s106_s0 = inlined_call_operand.hbm [shape: f32[1,2048], index: 0, kind: input, shape index: {}]   ;;  %s107_s1 = inlined_call_operand.hbm [shape: f32[1,2048], index: 1, kind: output, shape index: {}]  }
   0x1   :  { %7 = vsyncpa [#allocation4], 0  ;;  %s88_s6 = smov [#allocation2]  }
   0x2   :  { %s14_s7 = sshll.u32 %s88_s6, 4  ;;  %s15_s7 = int_to_ptr.vmem [resolvable:$true] %s14_s7 }
   0x3   :  { %s52_s8 = scalar_lea.vmem %s15_s7, 256  ;;  %p57_p1 = scmp.lt.s32.totalorder %s15_s7, %s15_s7 }
   0x4   :  { %p53_p0 = scmp.ne.s32.totalorder %s15_s7, %s52_s8  ;;  %p58_p2 = scmp.lt.s32.totalorder %s52_s8, %s52_s8 }
   0x6   :  { %p59_p3 = por %p58_p2, %p57_p1 }
   0x8   :  { %p60_p4 = pnand %p59_p3, %p53_p0 }
   0xa   :  { %63 = shalt.err (!%p60_p4)
}
   0xb   :  { %17 = dma.hbm_to_vmem [thread:$0]  %s106_s0, 256, %s15_s7, [#allocation3]  }
   0xc   :  { %84 = dma.done.wait [#allocation3], 256  }
   0xd   :  { %85 = vsyncadd [#allocation3], 4294967040  ;;  %s89_s11 = smov [#allocation5]   ;;  %v21_v0 = vld [vmem:[#allocation2] sm:$0xff]  ;;  %v22_v1 = vld [vmem:[#allocation2 + $0x8] sm:$0xff] }
   0xe   :  { %s33_s12 = sshll.u32 %s89_s11, 4  ;;  %v23_v2 = vmax.f32 %v21_v0, 0.0  ;;  %v24_v3 = vmax.f32 %v22_v1, 0.0  ;;  %s34_s12 = int_to_ptr.vmem [resolvable:$true] %s33_s12 }
   0xf   :  { %s64_s13 = scalar_lea.vmem %s34_s12, 256  ;;  %p69_p6 = scmp.lt.s32.totalorder %s34_s12, %s34_s12 }
  0x10   :  { %25 = vst [vmem:[#allocation5] sm:$0xff] %v23_v2  ;;  %26 = vst [vmem:[#allocation5 + $0x8] sm:$0xff] %v24_v3  ;;  %p65_p5 = scmp.ne.s32.totalorder %s34_s12, %s64_s13  ;;  %p70_p7 = scmp.lt.s32.totalorder %s64_s13, %s64_s13 }
  0x12   :  { %p71_p8 = por %p70_p7, %p69_p6 }
  0x14   :  { %p72_p9 = pnand %p71_p8, %p65_p5 }
  0x16   :  { %75 = shalt.err (!%p72_p9)
}
  0x17   :  { %36 = dma.vmem_to_hbm [thread:$0]  %s34_s12, 256, %s107_s1, [#allocation4]  }
  0x18   :  { %86 = dma.done.wait [#allocation4], 256  }
  0x19   :  { %87 = vsyncadd [#allocation4], 4294967040 }
  0x1a   :  { %40 = vsyncpa [#allocation3], 1 }
  0x1b   :  { %41 = vsyncpa [#allocation4], 1 }

</bundles_post_ra>
